<compile_context>
chip_gen: v7x
topology: tpu7x:2x2x1
jax: 0.10.0
libtpu: 0.0.40
codegen_flags: <defaults>
</compile_context>

<pallas_src>
import functools

import numpy as np
import jax
import jax.numpy as jnp
from jax.experimental import pallas as pl
from jax.experimental.pallas import tpu as pltpu


def _las_kernel(x_ref, label_ref, smoothing_ref, out_ref, *, batch, tile_rows):
    i = pl.program_id(0)

    x = x_ref[...].astype(jnp.float32)       # [TB, C]
    labels = label_ref[...]                  # [TB, 1] int32
    smoothing = smoothing_ref[...]           # [TB, 1] f32 (gathered in wrapper)

    # Stable log-sum-exp per row; logprobs never materialized.
    m = jnp.max(x, axis=-1, keepdims=True)                           # [TB, 1]
    lse = jnp.log(jnp.sum(jnp.exp(x - m), axis=-1, keepdims=True))   # [TB, 1]
    log_z = m + lse                                                  # [TB, 1]

    # x[label] via a single select + lane reduction (no onehot cast / mul).
    cls = jax.lax.broadcasted_iota(jnp.int32, (1, x.shape[-1]), 1)   # [1, C]
    x_at_label = jnp.sum(jnp.where(cls == labels, x, 0.0),
                         axis=-1, keepdims=True)                     # [TB, 1]

    nll_loss = log_z - x_at_label                                    # -logprobs[label]
    smooth_loss = log_z - jnp.mean(x, axis=-1, keepdims=True)        # -mean(logprobs)
    loss = (1.0 - smoothing) * nll_loss + smoothing * smooth_loss    # [TB, 1]

    # Mask rows past the true batch (partial last tile / padded reads), reduce
    # this tile to a single partial sum and store it lane-dense (one unmasked
    # vst of a full (8,128) vreg instead of TB/8 masked single-lane stores).
    row = i * tile_rows + jax.lax.broadcasted_iota(jnp.int32, loss.shape, 0)
    masked = jnp.where(row < batch, loss, 0.0)                       # [TB, 1]
    partial = jnp.sum(masked, axis=0, keepdims=True)                 # [1, 1]
    out_ref[...] = jnp.broadcast_to(partial, out_ref.shape)          # [8, 128]


def _choose_tile_rows(batch, n_classes, itemsize, target_tile_bytes=2 << 20):
    """Pick a batch tile (multiple of 8) targeting ~2 MiB per x tile.

    Capped at ~half the batch so small/medium batches still yield >= 2
    balanced grid tiles (keeps both v7x TensorCores busy under "parallel").
    """
    rows = max(1, target_tile_bytes // max(1, n_classes * itemsize))
    rows = max(8, (rows // 8) * 8)
    b_pad = ((batch + 7) // 8) * 8
    half = max(8, (((batch + 1) // 2 + 7) // 8) * 8)
    return min(rows, b_pad, half)


def label_aware_smoothing_loss(x, label, smooth, *, tile_rows=None):
    """x: [B, C] logits (f32 or bf16), label: [B] int, smooth: [C] f32 -> scalar."""
    B, C = x.shape
    if tile_rows is None:
        tile_rows = _choose_tile_rows(B, C, jnp.dtype(x.dtype).itemsize)
    num_tiles = pl.cdiv(B, tile_rows)

    label_2d = label.reshape(B, 1).astype(jnp.int32)
    # Per-row smoothing weight gathered host-side of the kernel (tiny [B] gather).
    smoothing_2d = smooth.astype(jnp.float32)[label].reshape(B, 1)

    kernel = functools.partial(_las_kernel, batch=B, tile_rows=tile_rows)

    partials = pl.pallas_call(
        kernel,
        out_shape=jax.ShapeDtypeStruct((num_tiles * 8, 128), jnp.float32),
        grid_spec=pltpu.PrefetchScalarGridSpec(
            num_scalar_prefetch=0,
            grid=(num_tiles,),
            in_specs=[
                pl.BlockSpec((tile_rows, C), lambda i: (i, 0)),   # logits tile
                pl.BlockSpec((tile_rows, 1), lambda i: (i, 0)),   # labels tile
                pl.BlockSpec((tile_rows, 1), lambda i: (i, 0)),   # per-row smoothing
            ],
            out_specs=pl.BlockSpec((8, 128), lambda i: (i, 0)),   # per-tile partial sum
        ),
        compiler_params=pltpu.CompilerParams(
            dimension_semantics=("parallel",),
        ),
    )(x, label_2d, smoothing_2d)

    # Each (8,128) block holds its tile's partial sum broadcast; pick one lane
    # per tile and finish the tiny reduction in plain JAX.
    per_tile = partials.reshape(num_tiles, 8 * 128)[:, 0]
    return jnp.sum(per_tile) / jnp.float32(B)


def build_smooth_vector(num_class_list, smooth_head=0.4, smooth_tail=0.1,
                        shape="concave", power=None):
    """Deterministic re-implementation of LabelAwareSmoothing.__init__."""
    ncl = np.asarray(num_class_list, dtype=np.float64)
    n_1 = ncl.max()
    n_k = ncl.min()
    if shape == "concave":
        smooth = smooth_tail + (smooth_head - smooth_tail) * np.sin(
            (ncl - n_k) * np.pi / (2.0 * (n_1 - n_k)))
    elif shape == "linear":
        smooth = smooth_tail + (smooth_head - smooth_tail) * (ncl - n_k) / (n_1 - n_k)
    elif shape == "convex":
        smooth = smooth_head + (smooth_head - smooth_tail) * np.sin(
            1.5 * np.pi + (ncl - n_k) * np.pi / (2.0 * (n_1 - n_k)))
    elif shape == "exp" and power is not None:
        smooth = smooth_tail + (smooth_head - smooth_tail) * np.power(
            (ncl - n_k) / (n_1 - n_k), power)
    else:
        raise ValueError("unsupported shape")
    return jnp.asarray(smooth, dtype=jnp.float32)


def _reference(x, label, smooth):
    smoothing = smooth[label]
    confidence = 1.0 - smoothing
    logprobs = jax.nn.log_softmax(x.astype(jnp.float32), axis=-1)
    nll_loss = -jnp.take_along_axis(logprobs, label[:, None], axis=-1)[:, 0]
    smooth_loss = -jnp.mean(logprobs, axis=-1)
    loss = confidence * nll_loss + smoothing * smooth_loss
    return jnp.mean(loss)


if __name__ == "__main__":
    # Deterministic "parameter" setup (synthetic long-tailed class counts).
    num_class_list = [100, 80, 60, 50, 40, 30, 25, 20, 15, 12, 10, 8, 6, 4, 3, 2]
    smooth = build_smooth_vector(num_class_list, smooth_head=0.4,
                                 smooth_tail=0.1, shape="concave")
    C = len(num_class_list)  # 16 classes

    key = jax.random.PRNGKey(0)

    # Case 1: small demo shape, single tile.
    B1 = 8
    k1x, k1l, key = jax.random.split(key, 3)
    x1 = jax.random.normal(k1x, (B1, C), dtype=jnp.float32)
    l1 = jax.random.randint(k1l, (B1,), 0, C, dtype=jnp.int32)
    loss1 = jax.block_until_ready(label_aware_smoothing_loss(x1, l1, smooth))
    ref1 = _reference(x1, l1, smooth)
    assert jnp.allclose(loss1, ref1, atol=1e-5, rtol=1e-5), (loss1, ref1)

    # Case 2: batch not a multiple of the tile -> multiple grid steps + masked
    # partial last tile (exercises the tiled / parallel path).
    B2 = 37
    k2x, k2l, key = jax.random.split(key, 3)
    x2 = jax.random.normal(k2x, (B2, C), dtype=jnp.float32)
    l2 = jax.random.randint(k2l, (B2,), 0, C, dtype=jnp.int32)
    loss2 = jax.block_until_ready(
        label_aware_smoothing_loss(x2, l2, smooth, tile_rows=8))
    ref2 = _reference(x2, l2, smooth)
    assert jnp.allclose(loss2, ref2, atol=1e-5, rtol=1e-5), (loss2, ref2)

    # Case 3: bf16 logits (half the HBM read traffic); kernel upcasts in VMEM.
    B3 = 24
    k3x, k3l, key = jax.random.split(key, 3)
    x3 = jax.random.normal(k3x, (B3, C), dtype=jnp.float32).astype(jnp.bfloat16)
    l3 = jax.random.randint(k3l, (B3,), 0, C, dtype=jnp.int32)
    loss3 = jax.block_until_ready(label_aware_smoothing_loss(x3, l3, smooth))
    ref3 = _reference(x3, l3, smooth)
    assert jnp.allclose(loss3, ref3, atol=1e-5, rtol=1e-5), (loss3, ref3)

    print("KERNEL_OK")
</pallas_src>

<mosaic_0001>
module attributes {stable_mosaic.version = 11 : i64} {
  func.func @_las_kernel(%arg0: i32, %arg1: memref<8x16xf32, #tpu.memory_space<vmem>>, %arg2: memref<8x1xi32, #tpu.memory_space<vmem>>, %arg3: memref<8x1xf32, #tpu.memory_space<vmem>>, %arg4: memref<8x128xf32, #tpu.memory_space<vmem>>) attributes {dimension_semantics = [#tpu.dimension_semantics<parallel>], iteration_bounds = array<i64: 1>, scalar_prefetch = 0 : i64, scratch_operands = 0 : i64, tpu.core_type = #tpu.core_type<tc>, window_params = [{transform_indices = @transform_0, window_bounds = array<i64: 8, 16>}, {transform_indices = @transform_1, window_bounds = array<i64: 8, 1>}, {transform_indices = @transform_2, window_bounds = array<i64: 8, 1>}, {transform_indices = @transform_3, window_bounds = array<i64: 8, 128>}]} {
    %c0 = arith.constant 0 : index
    %c0_0 = arith.constant 0 : index
    %0 = vector.load %arg1[%c0, %c0_0] : memref<8x16xf32, #tpu.memory_space<vmem>>, vector<8x16xf32>
    %c0_1 = arith.constant 0 : index
    %c0_2 = arith.constant 0 : index
    %1 = vector.load %arg2[%c0_1, %c0_2] : memref<8x1xi32, #tpu.memory_space<vmem>>, vector<8x1xi32>
    %c0_3 = arith.constant 0 : index
    %c0_4 = arith.constant 0 : index
    %2 = vector.load %arg3[%c0_3, %c0_4] : memref<8x1xf32, #tpu.memory_space<vmem>>, vector<8x1xf32>
    %cst = arith.constant dense<0xFF800000> : vector<8xf32>
    %3 = vector.multi_reduction <maximumf>, %0, %cst [1] : vector<8x16xf32> to vector<8xf32>
    %4 = vector.shape_cast %3 : vector<8xf32> to vector<8x1xf32>
    %5 = vector.broadcast %4 : vector<8x1xf32> to vector<8x16xf32>
    %6 = arith.subf %0, %5 : vector<8x16xf32>
    %7 = math.exp %6 : vector<8x16xf32>
    %cst_5 = arith.constant dense<0.000000e+00> : vector<8xf32>
    %8 = vector.multi_reduction <add>, %7, %cst_5 [1] : vector<8x16xf32> to vector<8xf32>
    %9 = vector.shape_cast %8 : vector<8xf32> to vector<8x1xf32>
    %10 = math.log %9 : vector<8x1xf32>
    %11 = arith.addf %4, %10 : vector<8x1xf32>
    %12 = tpu.iota {dimensions = array<i32: 1>} : vector<1x16xi32>
    %13 = vector.broadcast %12 : vector<1x16xi32> to vector<8x16xi32>
    %14 = vector.broadcast %1 : vector<8x1xi32> to vector<8x16xi32>
    %15 = arith.cmpi eq, %13, %14 : vector<8x16xi32>
    %cst_6 = arith.constant 0.000000e+00 : f32
    %16 = vector.broadcast %cst_6 : f32 to vector<8x16xf32>
    %17 = arith.select %15, %0, %16 : vector<8x16xi1>, vector<8x16xf32>
    %cst_7 = arith.constant dense<0.000000e+00> : vector<8xf32>
    %18 = vector.multi_reduction <add>, %17, %cst_7 [1] : vector<8x16xf32> to vector<8xf32>
    %19 = vector.shape_cast %18 : vector<8xf32> to vector<8x1xf32>
    %20 = arith.subf %11, %19 : vector<8x1xf32>
    %cst_8 = arith.constant dense<0.000000e+00> : vector<8xf32>
    %21 = vector.multi_reduction <add>, %0, %cst_8 [1] : vector<8x16xf32> to vector<8xf32>
    %22 = vector.shape_cast %21 : vector<8xf32> to vector<8x1xf32>
    %cst_9 = arith.constant 1.600000e+01 : f32
    %23 = vector.broadcast %cst_9 : f32 to vector<8x1xf32>
    %24 = arith.divf %22, %23 : vector<8x1xf32>
    %25 = arith.subf %11, %24 : vector<8x1xf32>
    %cst_10 = arith.constant 1.000000e+00 : f32
    %26 = vector.broadcast %cst_10 : f32 to vector<8x1xf32>
    %27 = arith.subf %26, %2 : vector<8x1xf32>
    %28 = arith.mulf %27, %20 : vector<8x1xf32>
    %29 = arith.mulf %2, %25 : vector<8x1xf32>
    %30 = arith.addf %28, %29 : vector<8x1xf32>
    %c8_i32 = arith.constant 8 : i32
    %31 = arith.muli %arg0, %c8_i32 : i32
    %32 = tpu.iota {dimensions = array<i32: 0>} : vector<8x1xi32>
    %33 = vector.broadcast %31 : i32 to vector<8x1xi32>
    %34 = arith.addi %33, %32 : vector<8x1xi32>
    %c8_i32_11 = arith.constant 8 : i32
    %35 = vector.broadcast %c8_i32_11 : i32 to vector<8x1xi32>
    %36 = arith.cmpi slt, %34, %35 : vector<8x1xi32>
    %cst_12 = arith.constant 0.000000e+00 : f32
    %37 = vector.broadcast %cst_12 : f32 to vector<8x1xf32>
    %38 = arith.select %36, %30, %37 : vector<8x1xi1>, vector<8x1xf32>
    %cst_13 = arith.constant dense<0.000000e+00> : vector<1xf32>
    %39 = vector.multi_reduction <add>, %38, %cst_13 [0] : vector<8x1xf32> to vector<1xf32>
    %40 = vector.shape_cast %39 : vector<1xf32> to vector<1x1xf32>
    %41 = vector.shape_cast %40 : vector<1x1xf32> to vector<1x1xf32>
    %42 = vector.broadcast %41 : vector<1x1xf32> to vector<8x128xf32>
    %c0_14 = arith.constant 0 : index
    %c0_15 = arith.constant 0 : index
    %43 = vector.load %arg4[%c0_14, %c0_15] : memref<8x128xf32, #tpu.memory_space<vmem>>, vector<8x128xf32>
    tpu.vector_store %arg4[%c0_14, %c0_15], %42 {strides = array<i32>} : memref<8x128xf32, #tpu.memory_space<vmem>>, vector<8x128xf32>,
    return
  }
  func.func @transform_0(%arg0: i32) -> (i32, i32) {
    %c0_i32 = arith.constant 0 : i32
    %c0_i32_0 = arith.constant 0 : i32
    return %arg0, %c0_i32 : i32, i32
  }
  func.func @transform_1(%arg0: i32) -> (i32, i32) {
    %c0_i32 = arith.constant 0 : i32
    %c0_i32_0 = arith.constant 0 : i32
    return %arg0, %c0_i32 : i32, i32
  }
  func.func @transform_2(%arg0: i32) -> (i32, i32) {
    %c0_i32 = arith.constant 0 : i32
    %c0_i32_0 = arith.constant 0 : i32
    return %arg0, %c0_i32 : i32, i32
  }
  func.func @transform_3(%arg0: i32) -> (i32, i32) {
    %c0_i32 = arith.constant 0 : i32
    %c0_i32_0 = arith.constant 0 : i32
    return %arg0, %c0_i32 : i32, i32
  }
}

</mosaic_0001>

<bundles_post_ra>
// kernel: tpu_custom_call.1
= control target key start
LH: loop header
LB: loop body
LE: loop exit
PB: predicated region body
PF: predicated region fallthrough
CT: control target
= control target key end

     0   :  { %vm18_vm0 = vcmask 130048   ;;  %s166_s0 = inlined_call_operand.vmem [shape: f32[8,16], index: 0, kind: input, shape index: {}]   ;;  %s167_s1 = inlined_call_operand.vmem [shape: s32[8,1], index: 1, kind: input, shape index: {}]   ;;  %s168_s2 = inlined_call_operand.vmem [shape: f32[8,1], index: 2, kind: input, shape index: {}]   ;;  %s169_s3 = inlined_call_operand.hbm [shape: f32[8,128], index: 3, kind: output, shape index: {}]  }
   0x1   :  { %v15_v0 = vld [vmem:[%s166_s0] sm:$0xff] }
   0x2   :  { %8 = vsyncpa [#allocation3], 0  ;;  %v19_v1 = vsel %vm18_vm0, %v15_v0, -inf  ;;  %v119_v2 = vmov 0   ;;  %v16_v3 = vld [vmem:[%s167_s1] sm:$0xff]  ;;  %v31_v7 = vlaneseq  ;;  %v42_v12 = vsel %vm18_vm0, %v15_v0, 0.0 }
   0x3   :  { %89 = vset.pattern.permute.xlu0 %v119_v2  ;;  %90 = vset.pattern.permute.xlu1 %v119_v2  ;;  %v17_v18 = vld [vmem:[%s168_s2] sm:$0xff]  ;;  %vm59_vm2 = vcmask 7168   ;;  %s120_s2 = smov [#allocation2]  }
   0x4   :  { %20 = vmax.xlane.f32.xlu0 %v19_v1  ;;  %v32_v8 = vand.u32 127, %v31_v7  ;;  %v48_v23 = vsub.f32 1.0, %v17_v18  ;;  %s79_s16 = sshll.u32 %s120_s2, 4  ;;  %s80_s16 = int_to_ptr.vmem [resolvable:$true] %s79_s16 }
   0x5   :  { %s95_s17 = scalar_lea.vmem %s80_s16, 128  ;;  %p100_p1 = scmp.lt.s32.totalorder %s80_s16, %s80_s16 }
   0x6   :  { %p96_p0 = scmp.ne.s32.totalorder %s80_s16, %s95_s17  ;;  %p101_p2 = scmp.lt.s32.totalorder %s95_s17, %s95_s17 }
   0x8   :  { %p102_p3 = por %p101_p2, %p100_p1 }
   0xa   :  { %p103_p4 = pnand %p102_p3, %p96_p0 }
  0x1a   :  { %34 = vperm.xlu0 %89, %v16_v3  }
  0x91   :  { %v21_v4 = vpop.xlane.xlu0 %20 }
  0x92   :  { %v22_v5 = vsub.f32 %v15_v0, %v21_v4 }
  0x94   :  { %v23_v6 = vmul.f32 1.442695, %v22_v5 }
  0x96   :  { %91 = vpow2.f32 %v23_v6 }
  0x99   :  { %v35_v9 = vpop.permute.xlu0 %34 }
  0x9a   :  { %vm36_vm1 = vcmp.eq.s32.totalorder %v32_v8, %v35_v9 }
  0x9b   :  { %v37_v13 = vsel %vm36_vm1, %v15_v0, 0.0 }
  0x9c   :  { %v38_v14 = vsel %vm18_vm0, %v37_v13, 0.0 }
  0xa0   :  { %v92_v10 = vpop.eup %91 }
  0xa1   :  { %v25_v11 = vsel %vm18_vm0, %v92_v10, 0.0 }
  0xa2   :  { %26 = vadd.xlane.f32.xlu1 %v25_v11 }
  0xa6   :  { %43 = vadd.xlane.f32.xlu1 %v42_v12 }
  0xaa   :  { %39 = vadd.xlane.f32.xlu1 %v38_v14 }
 0x12f   :  { %v27_v15 = vpop.xlane.xlu1 %26 }
 0x130   :  { %93 = vlog2.f32 %v27_v15 }
 0x133   :  { %v44_v16 = vpop.xlane.xlu1 %43 }
 0x134   :  { %v46_v22 = vmul.f32 0.0625, %v44_v16 }
 0x137   :  { %v40_v20 = vpop.xlane.xlu1 %39 }
 0x13a   :  { %v94_v17 = vpop.eup %93 }
 0x13b   :  { %v29_v19 = vmul.f32 0.6931472, %v94_v17 }
 0x13d   :  { %v30_v21 = vadd.f32 %v29_v19, %v21_v4 }
 0x13f   :  { %v47_v24 = vsub.f32 %v30_v21, %v46_v22  ;;  %v41_v25 = vsub.f32 %v30_v21, %v40_v20 }
 0x141   :  { %v50_v26 = vmul.f32 %v47_v24, %v17_v18  ;;  %v49_v27 = vmul.f32 %v48_v23, %v41_v25 }
 0x143   :  { %v51_v28 = vadd.f32 %v50_v26, %v49_v27 }
 0x145   :  { %v60_v29 = vsel %vm59_vm2, %v51_v28, 0.0 }
 0x146   :  { %v61_v30 = vrot.slane %v60_v29, 4 }
 0x148   :  { %v62_v31 = vadd.f32 %v61_v30, %v60_v29 }
 0x14a   :  { %v63_v32 = vrot.slane %v62_v31, 2 }
 0x14c   :  { %v64_v33 = vadd.f32 %v63_v32, %v62_v31 }
 0x14e   :  { %v65_v34 = vrot.slane %v64_v33, 1 }
 0x150   :  { %v66_v35 = vadd.f32 %v65_v34, %v64_v33 }
 0x152   :  { %69 = vperm.xlu1 %90, %v66_v35  }
 0x1d1   :  { %v70_v36 = vpop.permute.xlu1 %69 }
 0x1d2   :  { %72 = vst [vmem:[#allocation2] sm:$0xff] %v70_v36 }
 0x1d3   :  { %106 = shalt.err (!%p103_p4)
}
 0x1d4   :  { %s107_s20 = scalar_lea.hbm %s169_s3, 128 }
 0x1d5   :  { %p108_p5 = scmp.ne.s32.totalorder %s169_s3, %s107_s20  ;;  %p111_p6 = scmp.lt.u32.totalorder %s107_s20, %s169_s3 }
 0x1d7   :  { %p113_p7 = pnand %p111_p6, %p108_p5 }
 0x1d9   :  { %116 = shalt.err (!%p113_p7)
}
 0x1da   :  { %82 = dma.vmem_to_hbm [thread:$0]  %s80_s16, 128, %s169_s3, [#allocation3]  }
 0x1db   :  { %117 = dma.done.wait [#allocation3], 128  }
 0x1dc   :  { %118 = vsyncadd [#allocation3], 4294967168 }
 0x1dd   :  { %86 = vsyncpa [#allocation3], 1 }

</bundles_post_ra>
